<compile_context>
chip_gen: v6e
topology: v6e:2x2x1
jax: 0.10.0
libtpu: 0.0.40
codegen_flags: <defaults>
</compile_context>

<pallas_src>
import functools

import jax
import jax.numpy as jnp
from jax.experimental import pallas as pl
from jax.experimental.pallas import tpu as pltpu

FUDGE = 1e-07
LANE = 128          # lane width: last-dim alignment target
SUBLANE = 8         # sublane width: second-to-last-dim alignment target
MAX_BATCH_TILE = 256  # fills v6e/v7x MXU; ~1 MiB/out-buffer -> safe on v7x VMEM


def _round_up(x, m):
    return ((x + m - 1) // m) * m


def decoder_kernel(z_ref, w1_ref, b1_ref, w2_ref, b2_ref, out_ref):
    """One batch tile: (TB, Z) -> (TB, D_pad). Weights are VMEM-resident bf16."""
    # fc1: bf16 MXU matmul with f32 accumulation, bias add in f32.
    z_bf16 = z_ref[...].astype(jnp.bfloat16)
    h_lin = jnp.dot(z_bf16, w1_ref[...],
                    preferred_element_type=jnp.float32) + b1_ref[...]
    hidden = jax.nn.softplus(h_lin)                       # f32 EUP/VPU

    # fc21: bf16 MXU matmul with f32 accumulation, bias add in f32.
    logits = jnp.dot(hidden.astype(jnp.bfloat16), w2_ref[...],
                     preferred_element_type=jnp.float32) + b2_ref[...]
    mu = jax.nn.sigmoid(logits)                           # f32 EUP/VPU
    out_ref[...] = ((mu + FUDGE) * (1.0 - 2.0 * FUDGE)).astype(out_ref.dtype)


@functools.partial(jax.jit, static_argnames=("block_b",))
def decoder_forward(z, w1_t, b1, w2_t, b2, *, block_b=MAX_BATCH_TILE):
    """z: (B, z_dim); w1_t: (z_dim, H); b1: (1, H); w2_t: (H, D); b2: (1, D).

    Weights are stored pre-transposed (in_features, out_features) so the kernel
    does plain row-major MXU matmuls. Padding is handled here; the result is
    sliced back to (B, D).
    """
    B, Z = z.shape
    H = w1_t.shape[1]
    D = w2_t.shape[1]

    # Lane-align feature dims; zero-fill so padded lanes cannot leak:
    #  - extra columns of w1/b1 are 0 -> padded hidden lanes see softplus(0)=ln2
    #  - the matching extra ROWS of w2 are 0 -> those lanes contribute nothing
    #  - extra columns of w2/b2 are 0 -> padded output lanes are sliced off.
    H_pad = _round_up(H, LANE)
    D_pad = _round_up(D, LANE)

    # Batch tiling: tile of up to MAX_BATCH_TILE rows, sublane-aligned.
    TB = block_b if B >= block_b else _round_up(max(B, 1), SUBLANE)
    B_pad = _round_up(B, TB)

    zp = jnp.pad(z.astype(jnp.float32), ((0, B_pad - B), (0, 0)))
    w1p = jnp.pad(w1_t, ((0, 0), (0, H_pad - H))).astype(jnp.bfloat16)
    b1p = jnp.pad(b1.astype(jnp.float32), ((0, 0), (0, H_pad - H)))
    w2p = jnp.pad(w2_t, ((0, H_pad - H), (0, D_pad - D))).astype(jnp.bfloat16)
    b2p = jnp.pad(b2.astype(jnp.float32), ((0, 0), (0, D_pad - D)))

    grid = (B_pad // TB,)

    cost = pl.CostEstimate(
        flops=2 * B_pad * (Z * H_pad + H_pad * D_pad),
        transcendentals=B_pad * (2 * H_pad + D_pad),
        bytes_accessed=(zp.size * 4 + w1p.size * 2 + b1p.size * 4
                        + w2p.size * 2 + b2p.size * 4 + B_pad * D_pad * 4),
    )

    out_padded = pl.pallas_call(
        decoder_kernel,
        out_shape=jax.ShapeDtypeStruct((B_pad, D_pad), jnp.float32),
        grid=grid,
        in_specs=[
            pl.BlockSpec((TB, Z), lambda i: (i, 0)),        # z: tiled over batch
            pl.BlockSpec((Z, H_pad), lambda i: (0, 0)),     # w1: resident
            pl.BlockSpec((1, H_pad), lambda i: (0, 0)),     # b1: resident
            pl.BlockSpec((H_pad, D_pad), lambda i: (0, 0)),  # w2: resident
            pl.BlockSpec((1, D_pad), lambda i: (0, 0)),     # b2: resident
        ],
        out_specs=pl.BlockSpec((TB, D_pad), lambda i: (i, 0)),
        compiler_params=pltpu.CompilerParams(
            dimension_semantics=("parallel",),   # shards batch tiles on v7x's 2 TCs
            vmem_limit_bytes=64 << 20,
        ),
        cost_estimate=cost,
    )(zp, w1p, b1p, w2p, b2p)

    return out_padded[:B, :D]


def init_decoder_params(key, z_dim, hidden_dim, input_dim):
    """Deterministic PyTorch-style init: U(-1/sqrt(fan_in), 1/sqrt(fan_in))."""
    k1, k2, k3, k4 = jax.random.split(key, 4)
    lim1 = 1.0 / jnp.sqrt(jnp.float32(z_dim))
    lim2 = 1.0 / jnp.sqrt(jnp.float32(hidden_dim))
    # Stored transposed: (in_features, out_features)
    w1_t = jax.random.uniform(k1, (z_dim, hidden_dim), jnp.float32, -lim1, lim1)
    b1 = jax.random.uniform(k2, (1, hidden_dim), jnp.float32, -lim1, lim1)
    w2_t = jax.random.uniform(k3, (hidden_dim, input_dim), jnp.float32, -lim2, lim2)
    b2 = jax.random.uniform(k4, (1, input_dim), jnp.float32, -lim2, lim2)
    return w1_t, b1, w2_t, b2


def decoder_ref(z, w1_t, b1, w2_t, b2, weights_dtype=jnp.float32):
    """Pure-JAX reference; weights_dtype=bfloat16 mirrors the kernel's MXU path."""
    w1 = w1_t.astype(weights_dtype)
    w2 = w2_t.astype(weights_dtype)
    h_lin = jnp.dot(z.astype(weights_dtype), w1,
                    preferred_element_type=jnp.float32) + b1
    hidden = jax.nn.softplus(h_lin)
    logits = jnp.dot(hidden.astype(weights_dtype), w2,
                     preferred_element_type=jnp.float32) + b2
    mu = jax.nn.sigmoid(logits)
    return (mu + FUDGE) * (1.0 - 2.0 * FUDGE)


if __name__ == "__main__":
    # Small shapes consistent with the module: Decoder(z_dim, hidden_dim, input_dim)
    batch, z_dim, hidden_dim, input_dim = 8, 16, 64, 784

    key = jax.random.PRNGKey(0)
    k_params, k_z = jax.random.split(key)
    w1_t, b1, w2_t, b2 = init_decoder_params(k_params, z_dim, hidden_dim, input_dim)
    z = jax.random.normal(k_z, (batch, z_dim), jnp.float32)

    out = decoder_forward(z, w1_t, b1, w2_t, b2)
    out = jax.block_until_ready(out)
    assert out.shape == (batch, input_dim)

    # Check against a bf16-weight reference (same precision as the kernel's MXU path).
    ref_bf16 = decoder_ref(z, w1_t, b1, w2_t, b2, weights_dtype=jnp.bfloat16)
    assert jnp.allclose(out, ref_bf16, atol=5e-3, rtol=5e-3)

    # Sanity check against the full-f32 PyTorch-equivalent reference (loose tol for bf16).
    ref_f32 = decoder_ref(z, w1_t, b1, w2_t, b2, weights_dtype=jnp.float32)
    assert jnp.allclose(out, ref_f32, atol=5e-2, rtol=5e-2)

    print("KERNEL_OK")
</pallas_src>

<mosaic_0001>
module attributes {stable_mosaic.version = 11 : i64} {
  func.func @decoder_kernel(%arg0: i32, %arg1: memref<8x16xf32, #tpu.memory_space<vmem>>, %arg2: memref<16x128xbf16, #tpu.memory_space<vmem>>, %arg3: memref<1x128xf32, #tpu.memory_space<vmem>>, %arg4: memref<128x896xbf16, #tpu.memory_space<vmem>>, %arg5: memref<1x896xf32, #tpu.memory_space<vmem>>, %arg6: memref<8x896xf32, #tpu.memory_space<vmem>>) attributes {dimension_semantics = [#tpu.dimension_semantics<parallel>], iteration_bounds = array<i64: 1>, scalar_prefetch = 0 : i64, scratch_operands = 0 : i64, tpu.core_type = #tpu.core_type<tc>, window_params = [{transform_indices = @transform_0, window_bounds = array<i64: 8, 16>}, {pipeline_mode = #tpu.pipeline_mode<synchronous>, transform_indices = @transform_1, window_bounds = array<i64: 16, 128>}, {pipeline_mode = #tpu.pipeline_mode<synchronous>, transform_indices = @transform_2, window_bounds = array<i64: 1, 128>}, {pipeline_mode = #tpu.pipeline_mode<synchronous>, transform_indices = @transform_3, window_bounds = array<i64: 128, 896>}, {pipeline_mode = #tpu.pipeline_mode<synchronous>, transform_indices = @transform_4, window_bounds = array<i64: 1, 896>}, {transform_indices = @transform_5, window_bounds = array<i64: 8, 896>}]} {
    %c0 = arith.constant 0 : index
    %c0_0 = arith.constant 0 : index
    %0 = vector.load %arg1[%c0, %c0_0] : memref<8x16xf32, #tpu.memory_space<vmem>>, vector<8x16xf32>
    %1 = arith.truncf %0 : vector<8x16xf32> to vector<8x16xbf16>
    %c0_1 = arith.constant 0 : index
    %c0_2 = arith.constant 0 : index
    %2 = vector.load %arg2[%c0_1, %c0_2] : memref<16x128xbf16, #tpu.memory_space<vmem>>, vector<16x128xbf16>
    %cst = arith.constant dense<0.000000e+00> : vector<8x128xf32>
    %3 = tpu.matmul %1, %2, %cst {dimension_numbers = #tpu.dot_dimension_numbers<[1], [0], [0], [1], [0, 0, 1, 1], [], []>} : vector<8x16xbf16>, vector<16x128xbf16>, vector<8x128xf32> -> vector<8x128xf32>
    %c0_3 = arith.constant 0 : index
    %c0_4 = arith.constant 0 : index
    %4 = vector.load %arg3[%c0_3, %c0_4] : memref<1x128xf32, #tpu.memory_space<vmem>>, vector<1x128xf32>
    %5 = vector.broadcast %4 : vector<1x128xf32> to vector<8x128xf32>
    %6 = arith.addf %3, %5 : vector<8x128xf32>
    %cst_5 = arith.constant 0.000000e+00 : f32
    %7 = vector.broadcast %cst_5 : f32 to vector<8x128xf32>
    %8 = arith.maximumf %6, %7 : vector<8x128xf32>
    %9 = vector.broadcast %cst_5 : f32 to vector<8x128xf32>
    %10 = arith.subf %6, %9 : vector<8x128xf32>
    %11 = arith.cmpf one, %10, %10 : vector<8x128xf32>
    %12 = vector.broadcast %cst_5 : f32 to vector<8x128xf32>
    %13 = arith.addf %6, %12 : vector<8x128xf32>
    %14 = math.absf %10 : vector<8x128xf32>
    %cst_6 = arith.constant 0.000000e+00 : f32
    %15 = vector.broadcast %cst_6 : f32 to vector<8x128xf32>
    %16 = arith.subf %15, %14 : vector<8x128xf32>
    %17 = math.exp %16 : vector<8x128xf32>
    %18 = math.log1p %17 : vector<8x128xf32>
    %19 = arith.addf %8, %18 : vector<8x128xf32>
    %20 = arith.select %11, %13, %19 : vector<8x128xi1>, vector<8x128xf32>
    %21 = arith.truncf %20 : vector<8x128xf32> to vector<8x128xbf16>
    %c0_7 = arith.constant 0 : index
    %c0_8 = arith.constant 0 : index
    %22 = vector.load %arg4[%c0_7, %c0_8] : memref<128x896xbf16, #tpu.memory_space<vmem>>, vector<128x896xbf16>
    %cst_9 = arith.constant dense<0.000000e+00> : vector<8x896xf32>
    %23 = tpu.matmul %21, %22, %cst_9 {dimension_numbers = #tpu.dot_dimension_numbers<[1], [0], [0], [1], [0, 0, 1, 1], [], []>} : vector<8x128xbf16>, vector<128x896xbf16>, vector<8x896xf32> -> vector<8x896xf32>
    %c0_10 = arith.constant 0 : index
    %c0_11 = arith.constant 0 : index
    %24 = vector.load %arg5[%c0_10, %c0_11] : memref<1x896xf32, #tpu.memory_space<vmem>>, vector<1x896xf32>
    %25 = vector.broadcast %24 : vector<1x896xf32> to vector<8x896xf32>
    %26 = arith.addf %23, %25 : vector<8x896xf32>
    %27 = arith.negf %26 : vector<8x896xf32>
    %28 = math.exp %27 : vector<8x896xf32>
    %cst_12 = arith.constant 1.000000e+00 : f32
    %29 = vector.broadcast %cst_12 : f32 to vector<8x896xf32>
    %30 = arith.addf %29, %28 : vector<8x896xf32>
    %31 = arith.divf %29, %30 : vector<8x896xf32>
    %cst_13 = arith.constant 1.000000e-07 : f32
    %32 = vector.broadcast %cst_13 : f32 to vector<8x896xf32>
    %33 = arith.addf %31, %32 : vector<8x896xf32>
    %cst_14 = arith.constant 0.999999821 : f32
    %34 = vector.broadcast %cst_14 : f32 to vector<8x896xf32>
    %35 = arith.mulf %33, %34 : vector<8x896xf32>
    %c0_15 = arith.constant 0 : index
    %c0_16 = arith.constant 0 : index
    %36 = vector.load %arg6[%c0_15, %c0_16] : memref<8x896xf32, #tpu.memory_space<vmem>>, vector<8x896xf32>
    tpu.vector_store %arg6[%c0_15, %c0_16], %35 {strides = array<i32>} : memref<8x896xf32, #tpu.memory_space<vmem>>, vector<8x896xf32>,
    return
  }
  func.func @transform_0(%arg0: i32) -> (i32, i32) {
    %c0_i32 = arith.constant 0 : i32
    %c0_i32_0 = arith.constant 0 : i32
    return %arg0, %c0_i32 : i32, i32
  }
  func.func @transform_1(%arg0: i32) -> (i32, i32) {
    %c0_i32 = arith.constant 0 : i32
    %c0_i32_0 = arith.constant 0 : i32
    %c0_i32_1 = arith.constant 0 : i32
    return %c0_i32, %c0_i32_0 : i32, i32
  }
  func.func @transform_2(%arg0: i32) -> (i32, i32) {
    %c0_i32 = arith.constant 0 : i32
    %c0_i32_0 = arith.constant 0 : i32
    %c0_i32_1 = arith.constant 0 : i32
    return %c0_i32, %c0_i32_0 : i32, i32
  }
  func.func @transform_3(%arg0: i32) -> (i32, i32) {
    %c0_i32 = arith.constant 0 : i32
    %c0_i32_0 = arith.constant 0 : i32
    %c0_i32_1 = arith.constant 0 : i32
    return %c0_i32, %c0_i32_0 : i32, i32
  }
  func.func @transform_4(%arg0: i32) -> (i32, i32) {
    %c0_i32 = arith.constant 0 : i32
    %c0_i32_0 = arith.constant 0 : i32
    %c0_i32_1 = arith.constant 0 : i32
    return %c0_i32, %c0_i32_0 : i32, i32
  }
  func.func @transform_5(%arg0: i32) -> (i32, i32) {
    %c0_i32 = arith.constant 0 : i32
    %c0_i32_0 = arith.constant 0 : i32
    return %arg0, %c0_i32 : i32, i32
  }
}

</mosaic_0001>

<bundles_post_ra>
// kernel: decoder_forward.1
= control target key start
LH: loop header
LB: loop body
LE: loop exit
PB: predicated region body
PF: predicated region fallthrough
CT: control target
= control target key end

     0   :  { %v973_v1 = vmov 0.0   ;;  %vm974_vm0 = vmmov 0   ;;  %vm39_vm1 = vcmask 130048   ;;  %s1203_s0 = inlined_call_operand.vmem [shape: f32[8,16], index: 0, kind: input, shape index: {}]   ;;  %s1204_s1 = inlined_call_operand.vmem [shape: bf16[16,128], index: 1, kind: input, shape index: {}]   ;;  %s1205_s2 = inlined_call_operand.vmem [shape: f32[1,128], index: 2, kind: input, shape index: {}]   ;;  %s1206_s3 = inlined_call_operand.vmem [shape: bf16[128,896], index: 3, kind: input, shape index: {}]   ;;  %s1207_s4 = inlined_call_operand.vmem [shape: f32[1,896], index: 4, kind: input, shape index: {}]   ;;  %s1208_s5 = inlined_call_operand.hbm [shape: f32[8,896], index: 5, kind: output, shape index: {}]  }
   0x1   :  { %v838_v0 = vld [vmem:[%s1204_s1] sm:$0xff]   ;;  %808 = vmatprep.subr.bf16.mxu0 %v973_v1  ;;  %810 = vmatprep.mubr.msk.bf16.mxu0 %vm974_vm0, %v973_v1 }
   0x2   :  { %v22_v2 = vld [vmem:[%s1203_s0] sm:$0xff]  ;;  %809 = vmatpush3.bf16.msra.mxu0 %v838_v0 }
   0x3   :  { %v23_v3 = vpack.c.bf16 %v22_v2, %v22_v2 }
   0x5   :  { %811 = vmatmul.mubr.msk.bf16.vlgmr.msra.gmra.mxu0 %vm39_vm1, %v23_v3 }
   0x6   :  { %10 = vsyncpa [#allocation3], 0  ;;  %v839_v4 = vld [vmem:[%s1206_s3 + $0x18c] ss:$28 sps:$4 sm:$0xff]   ;;  %v843_v5 = vld [vmem:[%s1206_s3 + $0x194] ss:$28 sps:$4 sm:$0xff]  }
   0x7   :  { %v841_v6 = vld [vmem:[%s1206_s3 + $0x190] ss:$28 sps:$4 sm:$0xff]   ;;  %v844_v7 = vld [vmem:[%s1206_s3 + $0x188] ss:$28 sps:$4 sm:$0xff]   ;;  %491 = vmatprep.subr.bf16.mxu1 %v839_v4  ;;  %532 = vmatprep.subr.bf16.mxu0 %v843_v5  ;;  %v849_v9 = vld [vmem:[%s1206_s3 + $0x15c] ss:$28 sps:$4 sm:$0xff]  }
   0x8   :  { %492 = vmatpush1.bf16.msra.mxu1 %v844_v7  ;;  %533 = vmatpush1.bf16.msra.mxu0 %v841_v6  ;;  %v845_v8 = vld [vmem:[%s1206_s3 + $0x154] ss:$28 sps:$4 sm:$0xff]   ;;  %v851_v12 = vld [vmem:[%s1206_s3 + $0x11c] ss:$28 sps:$4 sm:$0xff]   ;;  %v855_v13 = vld [vmem:[%s1206_s3 + $0x124] ss:$28 sps:$4 sm:$0xff]  }
   0x9   :  { %v847_v10 = vld [vmem:[%s1206_s3 + $0x158] ss:$28 sps:$4 sm:$0xff]   ;;  %v850_v11 = vld [vmem:[%s1206_s3 + $0x150] ss:$28 sps:$4 sm:$0xff]   ;;  %493 = vmatprep.subr.bf16.mxu1 %v845_v8  ;;  %534 = vmatprep.subr.bf16.mxu0 %v849_v9  ;;  %v853_v14 = vld [vmem:[%s1206_s3 + $0x120] ss:$28 sps:$4 sm:$0xff]  }
   0xa   :  { %v856_v15 = vld [vmem:[%s1206_s3 + $0x118] ss:$28 sps:$4 sm:$0xff]   ;;  %v857_v16 = vld [vmem:[%s1206_s3 + $0xe4] ss:$28 sps:$4 sm:$0xff]   ;;  %v861_v17 = vld [vmem:[%s1206_s3 + $0xec] ss:$28 sps:$4 sm:$0xff]  }
   0xb   :  { %v859_v18 = vld [vmem:[%s1206_s3 + $0xe8] ss:$28 sps:$4 sm:$0xff]   ;;  %v862_v19 = vld [vmem:[%s1206_s3 + $0xe0] ss:$28 sps:$4 sm:$0xff]   ;;  %v867_v21 = vld [vmem:[%s1206_s3 + $0xb4] ss:$28 sps:$4 sm:$0xff]  }
   0xc   :  { %494 = vmatpush1.bf16.msra.mxu1 %v850_v11  ;;  %535 = vmatpush1.bf16.msra.mxu0 %v847_v10  ;;  %v863_v20 = vld [vmem:[%s1206_s3 + $0xac] ss:$28 sps:$4 sm:$0xff]   ;;  %v869_v24 = vld [vmem:[%s1206_s3 + $0x74] ss:$28 sps:$4 sm:$0xff]   ;;  %v873_v25 = vld [vmem:[%s1206_s3 + $0x7c] ss:$28 sps:$4 sm:$0xff]  }
   0xd   :  { %495 = vmatprep.subr.bf16.mxu1 %v851_v12  ;;  %536 = vmatprep.subr.bf16.mxu0 %v855_v13  ;;  %v865_v22 = vld [vmem:[%s1206_s3 + $0xb0] ss:$28 sps:$4 sm:$0xff]   ;;  %v868_v23 = vld [vmem:[%s1206_s3 + $0xa8] ss:$28 sps:$4 sm:$0xff]   ;;  %v871_v26 = vld [vmem:[%s1206_s3 + $0x78] ss:$28 sps:$4 sm:$0xff]  }
   0xe   :  { %v874_v27 = vld [vmem:[%s1206_s3 + $0x70] ss:$28 sps:$4 sm:$0xff]   ;;  %v875_v28 = vld [vmem:[%s1206_s3 + $0x3c] ss:$28 sps:$4 sm:$0xff]   ;;  %v879_v29 = vld [vmem:[%s1206_s3 + $0x44] ss:$28 sps:$4 sm:$0xff]  }
   0xf   :  { %v877_v30 = vld [vmem:[%s1206_s3 + $0x40] ss:$28 sps:$4 sm:$0xff]   ;;  %v880_v31 = vld [vmem:[%s1206_s3 + $0x38] ss:$28 sps:$4 sm:$0xff]   ;;  %v885_v33 = vld [vmem:[%s1206_s3 + $0xc] ss:$28 sps:$4 sm:$0xff]  }
  0x10   :  { %496 = vmatpush1.bf16.msra.mxu1 %v856_v15  ;;  %537 = vmatpush1.bf16.msra.mxu0 %v853_v14  ;;  %v881_v32 = vld [vmem:[%s1206_s3 + $0x4] ss:$28 sps:$4 sm:$0xff]   ;;  %v889_v36 = vld [vmem:[%s1206_s3 + $0x19c] ss:$28 sps:$4 sm:$0xff]   ;;  %v975_v37 = vmov 0  }
  0x11   :  { %497 = vmatprep.subr.bf16.mxu1 %v857_v16  ;;  %538 = vmatprep.subr.bf16.mxu0 %v861_v17  ;;  %v883_v34 = vld [vmem:[%s1206_s3 + $0x8] ss:$28 sps:$4 sm:$0xff]   ;;  %v886_v35 = vld [vmem:[%s1206_s3] ss:$28 sps:$4 sm:$0xff]   ;;  %v887_v58 = vld [vmem:[%s1206_s3 + $0x198] ss:$28 sps:$4 sm:$0xff]  }
  0x12   :  { %523 = vmatprep.mubr.bf16.mxu1 %v975_v37  ;;  %564 = vmatprep.mubr.bf16.mxu0 %v975_v37  ;;  %v731_v38 = vld [vmem:[%s1205_s2] ss:$0 sm:$0xff]  ;;  %v894_v0 = vld [vmem:[%s1206_s3 + $0x168] ss:$28 sps:$4 sm:$0xff]   ;;  %v898_v4 = vld [vmem:[%s1206_s3 + $0x130] ss:$28 sps:$4 sm:$0xff]  }
  0x13   :  { %v890_v60 = vld [vmem:[%s1206_s3 + $0x1a0] ss:$28 sps:$4 sm:$0xff]   ;;  %v897_v2 = vld [vmem:[%s1206_s3 + $0x12c] ss:$28 sps:$4 sm:$0xff]   ;;  %v901_v5 = vld [vmem:[%s1206_s3 + $0xf4] ss:$28 sps:$4 sm:$0xff]  }
  0x14   :  { %498 = vmatpush1.bf16.msra.mxu1 %v862_v19  ;;  %539 = vmatpush1.bf16.msra.mxu0 %v859_v18  ;;  %v893_v62 = vld [vmem:[%s1206_s3 + $0x164] ss:$28 sps:$4 sm:$0xff]   ;;  %v899_v6 = vld [vmem:[%s1206_s3 + $0xf0] ss:$28 sps:$4 sm:$0xff]   ;;  %v902_v7 = vld [vmem:[%s1206_s3 + $0xf8] ss:$28 sps:$4 sm:$0xff]  }
  0x15   :  { %499 = vmatprep.subr.bf16.mxu1 %v863_v20  ;;  %540 = vmatprep.subr.bf16.mxu0 %v867_v21  ;;  %v891_v63 = vld [vmem:[%s1206_s3 + $0x160] ss:$28 sps:$4 sm:$0xff]   ;;  %v895_v3 = vld [vmem:[%s1206_s3 + $0x128] ss:$28 sps:$4 sm:$0xff]   ;;  %v903_v9 = vld [vmem:[%s1206_s3 + $0xb8] ss:$28 sps:$4 sm:$0xff]   ;;  %v168_v20 = vlaneseq }
  0x16   :  { %v905_v8 = vld [vmem:[%s1206_s3 + $0xbc] ss:$28 sps:$4 sm:$0xff]   ;;  %v909_v11 = vld [vmem:[%s1206_s3 + $0x84] ss:$28 sps:$4 sm:$0xff]   ;;  %v913_v14 = vld [vmem:[%s1206_s3 + $0x4c] ss:$28 sps:$4 sm:$0xff]  }
  0x17   :  { %v906_v10 = vld [vmem:[%s1206_s3 + $0xc0] ss:$28 sps:$4 sm:$0xff]   ;;  %v910_v13 = vld [vmem:[%s1206_s3 + $0x88] ss:$28 sps:$4 sm:$0xff]   ;;  %v914_v16 = vld [vmem:[%s1206_s3 + $0x50] ss:$28 sps:$4 sm:$0xff]  }
  0x18   :  { %500 = vmatpush1.bf16.msra.mxu1 %v868_v23  ;;  %541 = vmatpush1.bf16.msra.mxu0 %v865_v22  ;;  %v907_v12 = vld [vmem:[%s1206_s3 + $0x80] ss:$28 sps:$4 sm:$0xff]   ;;  %v911_v15 = vld [vmem:[%s1206_s3 + $0x48] ss:$28 sps:$4 sm:$0xff]   ;;  %v917_v17 = vld [vmem:[%s1206_s3 + $0x14] ss:$28 sps:$4 sm:$0xff]  }
  0x19   :  { %501 = vmatprep.subr.bf16.mxu1 %v869_v24  ;;  %542 = vmatprep.subr.bf16.mxu0 %v873_v25  ;;  %v915_v18 = vld [vmem:[%s1206_s3 + $0x10] ss:$28 sps:$4 sm:$0xff]   ;;  %v918_v19 = vld [vmem:[%s1206_s3 + $0x18] ss:$28 sps:$4 sm:$0xff]   ;;  %v169_v21 = vshrl.u32 %v168_v20, 7  ;;  %v166_v24 = vld [vmem:[%s1207_s4] sm:$0xff] }
  0x1a   :  { %s976_s3 = smov [#allocation2]  }
  0x1b   :  { %v170_v22 = vsub.s32 0, %v169_v21  ;;  %v178_v23 = vsub.s32 2, %v169_v21  ;;  %v174_v25 = vsub.s32 1, %v169_v21  ;;  %s723_s4 = sshll.u32 %s976_s3, 4  ;;  %s724_s4 = int_to_ptr.vmem [resolvable:$true] %s723_s4 }
  0x1c   :  { %502 = vmatpush1.bf16.msra.mxu1 %v874_v27  ;;  %543 = vmatpush1.bf16.msra.mxu0 %v871_v26  ;;  %v182_v26 = vsub.s32 3, %v169_v21  ;;  %s951_s0 = scalar_lea.vmem %s724_s4, 896  ;;  %p956_p1 = scmp.lt.s32.totalorder %s724_s4, %s724_s4 }
  0x1d   :  { %503 = vmatprep.subr.bf16.mxu1 %v875_v28  ;;  %544 = vmatprep.subr.bf16.mxu0 %v879_v29  ;;  %v171_v27 = vrot.slane %v166_v24, %v170_v22  ;;  %v179_v28 = vrot.slane %v166_v24, %v178_v23  ;;  %v175_v29 = vrot.slane %v166_v24, %v174_v25  ;;  %p952_p0 = scmp.ne.s32.totalorder %s724_s4, %s951_s0  ;;  %p957_p2 = scmp.lt.s32.totalorder %s951_s0, %s951_s0 }
  0x1f   :  { %p958_p3 = por %p957_p2, %p956_p1 }
  0x20   :  { %504 = vmatpush1.bf16.msra.mxu1 %v880_v31  ;;  %545 = vmatpush1.bf16.msra.mxu0 %v877_v30  ;;  %v183_v30 = vrot.slane %v166_v24, %v182_v26 }
  0x21   :  { %505 = vmatprep.subr.bf16.mxu1 %v881_v32  ;;  %546 = vmatprep.subr.bf16.mxu0 %v885_v33  ;;  %p959_p4 = pnand %p958_p3, %p952_p0 }
  0x24   :  { %506 = vmatpush1.bf16.msra.mxu1 %v886_v35  ;;  %547 = vmatpush1.bf16.msra.mxu0 %v883_v34 }
  0x25   :  { %573 = vmatprep.subr.bf16.mxu1 %v889_v36  ;;  %814 = vmatprep.subr.bf16.mxu0 %v973_v1 }
  0xc5   :  { %v77_v39 = vpop.f32.mrf.mxu0 }
  0xc6   :  { %v78_v40 = vadd.f32 %v731_v38, %v77_v39 }
  0xc7   :  { %v812_v41 = vpop.f32.mrf.mxu0 }
  0xc8   :  { %v86_v42 = vand.u32 2147483647, %v78_v40  ;;  %v83_v55 = vmax.f32 %v78_v40, 0.0  ;;  %vm84_vm3 = vcmp.ne.f32.partialorder %v78_v40, %v78_v40 }
  0xc9   :  { %v80_v43 = vpop.f32.mrf.mxu0 }
  0xca   :  { %v87_v44 = vsub.f32 0.0, %v86_v42 }
  0xcb   :  { %v813_v45 = vpop.f32.mrf.mxu0 }
  0xcc   :  { %v88_v46 = vmul.f32 1.442695, %v87_v44 }
  0xce   :  { %919 = vpow2.f32 %v88_v46 }
  0xdb   :  { %v920_v47 = vpop.eup %919 }
  0xdc   :  { %v90_v48 = vadd.f32 1.0, %v920_v47  ;;  %v93_v49 = vmul.f32 -0.5, %v920_v47  ;;  %v96_v51 = vand.u32 2147483647, %v920_v47 }
  0xde   :  { %921 = vlog2.f32 %v90_v48  ;;  %v94_v50 = vadd.f32 1.0, %v93_v49  ;;  %vm97_vm2 = vcmp.lt.f32.partialorder %v96_v51, 0.0004427343 }
  0xe0   :  { %v95_v54 = vmul.f32 %v920_v47, %v94_v50 }
  0xeb   :  { %v922_v52 = vpop.eup %921 }
  0xec   :  { %v92_v53 = vmul.f32 0.6931472, %v922_v52 }
  0xee   :  { %v98_v56 = vsel %vm97_vm2, %v95_v54, %v92_v53  ;;  %v186_v54 = vsub.s32 4, %v169_v21 }
  0xef   :  { %v99_v57 = vadd.f32 %v98_v56, %v83_v55  ;;  %v194_v55 = vsub.s32 6, %v169_v21  ;;  %v190_v56 = vsub.s32 5, %v169_v21 }
  0xf1   :  { %v100_v59 = vsel %vm84_vm3, %v78_v40, %v99_v57  ;;  %v187_v57 = vrot.slane %v166_v24, %v186_v54 }
  0xf2   :  { %v101_v61 = vpack.c.bf16 %v100_v59, %v100_v59  ;;  %v191_v59 = vrot.slane %v166_v24, %v190_v56 }
  0xf4   :  { %524 = vmatmul.mubr.bf16.vlgmr.msra.gmra.mxu1 %v101_v61  ;;  %565 = vmatmul.mubr.bf16.vlgmr.msra.gmra.mxu0 %v101_v61 }
  0xf5   :  { %574 = vmatpush1.bf16.msra.mxu1 %v887_v58  ;;  %815 = vmatpush3.bf16.msra.mxu0 %v890_v60  ;;  %v195_v58 = vrot.slane %v166_v24, %v194_v55 }
  0xf6   :  { %575 = vmatprep.subr.bf16.mxu1 %v893_v62  ;;  %816 = vmatprep.subr.bf16.mxu0 %v973_v1 }
  0xf7   :  { %605 = vmatprep.mubr.bf16.mxu1 %v975_v37  ;;  %830 = vmatprep.mubr.msk.bf16.mxu0 %vm974_vm0, %v973_v1 }
  0xf9   :  { %576 = vmatpush1.bf16.msra.mxu1 %v891_v63  ;;  %817 = vmatpush3.bf16.msra.mxu0 %v894_v0 }
  0xfa   :  { %577 = vmatprep.subr.bf16.mxu1 %v897_v2  ;;  %818 = vmatprep.subr.bf16.mxu0 %v973_v1 }
  0xfd   :  { %578 = vmatpush1.bf16.msra.mxu1 %v895_v3  ;;  %819 = vmatpush3.bf16.msra.mxu0 %v898_v4 }
  0xfe   :  { %579 = vmatprep.subr.bf16.mxu1 %v901_v5  ;;  %820 = vmatprep.subr.bf16.mxu0 %v973_v1 }
 0x101   :  { %580 = vmatpush1.bf16.msra.mxu1 %v899_v6  ;;  %821 = vmatpush3.bf16.msra.mxu0 %v902_v7 }
 0x102   :  { %581 = vmatprep.subr.bf16.mxu1 %v905_v8  ;;  %822 = vmatprep.subr.bf16.mxu0 %v973_v1 }
 0x105   :  { %582 = vmatpush1.bf16.msra.mxu1 %v903_v9  ;;  %823 = vmatpush3.bf16.msra.mxu0 %v906_v10 }
 0x106   :  { %583 = vmatprep.subr.bf16.mxu1 %v909_v11  ;;  %824 = vmatprep.subr.bf16.mxu0 %v973_v1 }
 0x109   :  { %584 = vmatpush1.bf16.msra.mxu1 %v907_v12  ;;  %825 = vmatpush3.bf16.msra.mxu0 %v910_v13 }
 0x10a   :  { %585 = vmatprep.subr.bf16.mxu1 %v913_v14  ;;  %826 = vmatprep.subr.bf16.mxu0 %v973_v1 }
 0x10d   :  { %586 = vmatpush1.bf16.msra.mxu1 %v911_v15  ;;  %827 = vmatpush3.bf16.msra.mxu0 %v914_v16 }
 0x10e   :  { %587 = vmatprep.subr.bf16.mxu1 %v917_v17  ;;  %828 = vmatprep.subr.bf16.mxu0 %v973_v1 }
 0x111   :  { %588 = vmatpush1.bf16.msra.mxu1 %v915_v18  ;;  %829 = vmatpush3.bf16.msra.mxu0 %v918_v19 }
 0x114   :  { %606 = vmatmul.mubr.bf16.vlgmr.msra.gmra.mxu1 %v101_v61  ;;  %831 = vmatmul.mubr.bf16.vlgmr.msra.gmra.mxu0 %v101_v61 }
 0x1b4   :  { %v525_v31 = vpop.f32.mrf.mxu1  ;;  %v566_v1 = vpop.f32.mrf.mxu0 }
 0x1b5   :  { %v526_v32 = vadd.f32 %v525_v31, %v171_v27  ;;  %v567_v33 = vadd.f32 %v566_v1, %v179_v28 }
 0x1b6   :  { %v527_v34 = vpop.f32.mrf.mxu1  ;;  %v568_v35 = vpop.f32.mrf.mxu0 }
 0x1b7   :  { %v790_v36 = vmul.f32 -1.442695, %v526_v32  ;;  %v792_v37 = vmul.f32 -1.442695, %v567_v33  ;;  %v528_v38 = vadd.f32 %v527_v34, %v175_v29  ;;  %v569_v39 = vadd.f32 %v568_v35, %v183_v30 }
 0x1b8   :  { %v529_v40 = vpop.f32.mrf.mxu1  ;;  %v570_v41 = vpop.f32.mrf.mxu0 }
 0x1b9   :  { %923 = vpow2.f32 %v790_v36  ;;  %v791_v42 = vmul.f32 -1.442695, %v528_v38  ;;  %v793_v43 = vmul.f32 -1.442695, %v569_v39 }
 0x1ba   :  { %925 = vpow2.f32 %v792_v37  ;;  %v530_v44 = vpop.f32.mrf.mxu1  ;;  %v571_v45 = vpop.f32.mrf.mxu0 }
 0x1bb   :  { %927 = vpow2.f32 %v791_v42 }
 0x1bc   :  { %929 = vpow2.f32 %v793_v43 }
 0x1c6   :  { %v924_v46 = vpop.eup %923 }
 0x1c7   :  { %v926_v47 = vpop.eup %925  ;;  %v675_v48 = vadd.f32 1.0, %v924_v46 }
 0x1c8   :  { %v928_v49 = vpop.eup %927  ;;  %v677_v50 = vadd.f32 1.0, %v926_v47 }
 0x1c9   :  { %v930_v51 = vpop.eup %929  ;;  %931 = vrcp.f32 %v675_v48  ;;  %v676_v52 = vadd.f32 1.0, %v928_v49 }
 0x1ca   :  { %933 = vrcp.f32 %v677_v50  ;;  %v678_v53 = vadd.f32 1.0, %v930_v51 }
 0x1cb   :  { %935 = vrcp.f32 %v676_v52 }
 0x1cc   :  { %937 = vrcp.f32 %v678_v53 }
 0x1d4   :  { %v607_v60 = vpop.f32.mrf.mxu1  ;;  %v648_v61 = vpop.f32.mrf.mxu0 }
 0x1d5   :  { %v608_v62 = vadd.f32 %v607_v60, %v187_v57  ;;  %v649_v63 = vadd.f32 %v648_v61, %v195_v58 }
 0x1d6   :  { %v932_v0 = vpop.eup %931  ;;  %v609_v2 = vpop.f32.mrf.mxu1 }
 0x1d7   :  { %v832_v3 = vpop.f32.mrf.mxu0  ;;  %v934_v4 = vpop.eup %933  ;;  %v696_v5 = vadd.f32 1e-07, %v932_v0  ;;  %v794_v6 = vmul.f32 -1.442695, %v608_v62  ;;  %v796_v7 = vmul.f32 -1.442695, %v649_v63  ;;  %v610_v8 = vadd.f32 %v609_v2, %v191_v59 }
 0x1d8   :  { %v936_v9 = vpop.eup %935  ;;  %v698_v10 = vadd.f32 1e-07, %v934_v4  ;;  %v611_v11 = vpop.f32.mrf.mxu1 }
 0x1d9   :  { %v651_v12 = vpop.f32.mrf.mxu0  ;;  %v938_v13 = vpop.eup %937  ;;  %v703_v14 = vmul.f32 0.9999998, %v696_v5  ;;  %v697_v15 = vadd.f32 1e-07, %v936_v9  ;;  %939 = vpow2.f32 %v794_v6  ;;  %v795_v16 = vmul.f32 -1.442695, %v610_v8 }
 0x1da   :  { %v705_v17 = vmul.f32 0.9999998, %v698_v10  ;;  %v699_v18 = vadd.f32 1e-07, %v938_v13  ;;  %941 = vpow2.f32 %v796_v7  ;;  %v612_v19 = vpop.f32.mrf.mxu1 }
 0x1db   :  { %v833_v20 = vpop.f32.mrf.mxu0  ;;  %710 = vst [vmem:[#allocation2] sm:$0xff] %v703_v14  ;;  %v704_v21 = vmul.f32 0.9999998, %v697_v15  ;;  %943 = vpow2.f32 %v795_v16 }
 0x1dc   :  { %712 = vst [vmem:[#allocation2 + $0x10] sm:$0xff] %v705_v17  ;;  %v706_v22 = vmul.f32 0.9999998, %v699_v18 }
 0x1dd   :  { %711 = vst [vmem:[#allocation2 + $0x8] sm:$0xff] %v704_v21 }
 0x1de   :  { %713 = vst [vmem:[#allocation2 + $0x18] sm:$0xff] %v706_v22 }
 0x1e6   :  { %v940_v23 = vpop.eup %939 }
 0x1e7   :  { %v942_v24 = vpop.eup %941  ;;  %v679_v25 = vadd.f32 1.0, %v940_v23 }
 0x1e8   :  { %v944_v26 = vpop.eup %943  ;;  %v681_v27 = vadd.f32 1.0, %v942_v24 }
 0x1e9   :  { %945 = vrcp.f32 %v679_v25  ;;  %v680_v28 = vadd.f32 1.0, %v944_v26 }
 0x1ea   :  { %947 = vrcp.f32 %v681_v27 }
 0x1eb   :  { %949 = vrcp.f32 %v680_v28 }
 0x1f6   :  { %v946_v29 = vpop.eup %945 }
 0x1f7   :  { %v948_v30 = vpop.eup %947  ;;  %v700_v31 = vadd.f32 1e-07, %v946_v29 }
 0x1f8   :  { %v950_v1 = vpop.eup %949  ;;  %v702_v32 = vadd.f32 1e-07, %v948_v30 }
 0x1f9   :  { %v707_v33 = vmul.f32 0.9999998, %v700_v31  ;;  %v701_v34 = vadd.f32 1e-07, %v950_v1 }
 0x1fa   :  { %v709_v35 = vmul.f32 0.9999998, %v702_v32 }
 0x1fb   :  { %714 = vst [vmem:[#allocation2 + $0x20] sm:$0xff] %v707_v33  ;;  %v708_v36 = vmul.f32 0.9999998, %v701_v34 }
 0x1fc   :  { %716 = vst [vmem:[#allocation2 + $0x30] sm:$0xff] %v709_v35 }
 0x1fd   :  { %715 = vst [vmem:[#allocation2 + $0x28] sm:$0xff] %v708_v36 }
 0x1fe   :  { %962 = shalt.err (!%p959_p4)
}
 0x1ff   :  { %726 = dma.vmem_to_hbm [thread:$0]  %s724_s4, 896, %s1208_s5, [#allocation3]  }
 0x200   :  { %971 = dma.done.wait [#allocation3], 896  }
 0x201   :  { %972 = vsyncadd [#allocation3], 4294966400 }
 0x202   :  { %730 = vsyncpa [#allocation3], 1 }

</bundles_post_ra>
